<compile_context>
chip_gen: v6e
topology: v6e:2x2x1
jax: 0.10.0
libtpu: 0.0.40
codegen_flags: <defaults>
</compile_context>

<pallas_src>
from functools import partial

import jax
import jax.numpy as jnp
from jax import lax
from jax.experimental import pallas as pl
from jax.experimental.pallas import tpu as pltpu


def _round_up(x, m):
    return ((x + m - 1) // m) * m


# ---------------------------------------------------------------------------
# Linear:  y = x @ W (+ b), tiled over tokens and output columns.
# ---------------------------------------------------------------------------
def _linear_bias_kernel(x_ref, w_ref, b_ref, o_ref):
    y = jnp.dot(x_ref[...], w_ref[...], preferred_element_type=jnp.float32)
    o_ref[...] = (y + b_ref[...].astype(jnp.float32)).astype(o_ref.dtype)


def _linear_kernel(x_ref, w_ref, o_ref):
    o_ref[...] = jnp.dot(x_ref[...], w_ref[...],
                         preferred_element_type=jnp.float32).astype(o_ref.dtype)


def linear_pallas(x2d, w, b=None, *, tile_m=256, tile_n=512):
    """x2d: (M, K), w: (K, N), b: (N,) or None -> (M, N)."""
    M, K = x2d.shape
    N_out = w.shape[1]

    # Token tile: sublane aligned; pad M up so the tile divides it.
    tm = min(tile_m, _round_up(M, 8))
    Mp = _round_up(M, tm)
    if Mp != M:
        x2d = jnp.pad(x2d, ((0, Mp - M), (0, 0)))

    # Output-column tile: keeps the resident weight block (K, tn) well under
    # the scoped VMEM budget (v7x: 64 MiB physical / 32 MiB scoped default;
    # v5e: 16 MiB scoped default) while staying lane-dense.
    if N_out > tile_n and N_out % 128 == 0:
        tn = max(t for t in range(128, tile_n + 1, 128) if N_out % t == 0)
    else:
        tn = N_out

    grid = (Mp // tm, N_out // tn)
    in_specs = [
        pl.BlockSpec((tm, K), lambda i, j: (i, 0)),   # x tile (reused over j)
        pl.BlockSpec((K, tn), lambda i, j: (0, j)),   # weight column block
    ]
    args = [x2d, w]
    kernel = _linear_kernel
    if b is not None:
        in_specs.append(pl.BlockSpec((1, tn), lambda i, j: (0, j)))
        args.append(b.reshape(1, N_out))
        kernel = _linear_bias_kernel

    out = pl.pallas_call(
        kernel,
        out_shape=jax.ShapeDtypeStruct((Mp, N_out), x2d.dtype),
        grid_spec=pltpu.PrefetchScalarGridSpec(
            num_scalar_prefetch=0,
            grid=grid,
            in_specs=in_specs,
            out_specs=pl.BlockSpec((tm, tn), lambda i, j: (i, j)),
        ),
        compiler_params=pltpu.CompilerParams(
            dimension_semantics=("parallel", "parallel")),
    )(*args)

    return out[:M] if Mp != M else out


# ---------------------------------------------------------------------------
# Flash-style attention core, reading q/k/v straight out of the QKV activation.
# ---------------------------------------------------------------------------
def _flash_kernel(q_ref, k_ref, v_ref, o_ref, m_sc, l_sc, acc_sc, *,
                  scale, heads, head_dim, seq_len, tile_kv, needs_mask):
    # q_ref/k_ref/v_ref/o_ref: (1, t, heads*head_dim)
    ki = pl.program_id(3)

    @pl.when(ki == 0)
    def _():
        m_sc[...] = jnp.full(m_sc.shape, -jnp.inf, m_sc.dtype)
        l_sc[...] = jnp.zeros(l_sc.shape, l_sc.dtype)
        acc_sc[...] = jnp.zeros(acc_sc.shape, acc_sc.dtype)

    q_all = q_ref[0]
    k_all = k_ref[0]
    v_all = v_ref[0]

    if needs_mask:
        col = ki * tile_kv + lax.broadcasted_iota(jnp.int32, (1, tile_kv), 1)
        valid = col < seq_len                      # (1, tile_kv)

    # Static loop over the heads in this block: same matmul shapes as one head
    # per grid step, but the ~0.35us per-step overhead is paid only once.
    for g in range(heads):
        lo = g * head_dim
        q = q_all[:, lo:lo + head_dim]
        k = k_all[:, lo:lo + head_dim]
        v = v_all[:, lo:lo + head_dim]

        # (t, hd) x (t, hd) contracting over hd -> (t, t), f32 accumulation.
        s = lax.dot_general(q, k, (((1,), (1,)), ((), ())),
                            preferred_element_type=jnp.float32) * scale
        if needs_mask:
            s = jnp.where(valid, s, -jnp.inf)

        m_prev = m_sc[g]
        m_new = jnp.maximum(m_prev, s.max(axis=-1, keepdims=True))
        alpha = jnp.exp(m_prev - m_new)
        p = jnp.exp(s - m_new)
        l_sc[g] = alpha * l_sc[g] + p.sum(axis=-1, keepdims=True)
        acc_sc[g] = alpha * acc_sc[g] + jnp.dot(
            p.astype(v.dtype), v, preferred_element_type=jnp.float32)
        m_sc[g] = m_new

    @pl.when(ki == pl.num_programs(3) - 1)
    def _():
        outs = [acc_sc[g] * pl.reciprocal(l_sc[g], approx=True)
                for g in range(heads)]
        # One lane-dense store of the whole (t, heads*head_dim) output block.
        o_ref[0] = jnp.concatenate(outs, axis=-1).astype(o_ref.dtype)


def _pick_heads_per_block(num_heads, head_dim):
    # Largest divisor of H whose combined lane width is 128-aligned and not
    # overly wide; amortizes per-grid-step overhead over several heads.
    cands = [g for g in range(1, num_heads + 1)
             if num_heads % g == 0 and (g * head_dim) % 128 == 0
             and g * head_dim <= 1024]
    if cands:
        return max(cands)
    cands = [g for g in range(1, num_heads + 1)
             if num_heads % g == 0 and (g * head_dim) % 128 == 0]
    if cands:
        return min(cands)
    # TODO(synk): head_dims with no 128-lane-aligned grouping fall back to one
    # head per step (sub-128 lane blocks).
    return 1


def flash_attention_pallas(qkv, *, num_heads, head_dim, seq_len, tile_seq, scale):
    """qkv: (B, Np, 3*C), column layout [q heads | k heads | v heads].
    Returns (B, Np, C) with heads merged along the last axis (token-major)."""
    B, Np, C3 = qkv.shape
    H, hd = num_heads, head_dim
    C = H * hd
    assert C3 == 3 * C and Np % tile_seq == 0

    G = _pick_heads_per_block(H, hd)
    n_groups = H // G
    gw = G * hd
    t = tile_seq
    needs_mask = Np != seq_len

    kernel = partial(_flash_kernel, scale=scale, heads=G, head_dim=hd,
                     seq_len=seq_len, tile_kv=t, needs_mask=needs_mask)

    q_spec = pl.BlockSpec((1, t, gw), lambda b, g, qi, ki: (b, qi, g))
    k_spec = pl.BlockSpec((1, t, gw), lambda b, g, qi, ki: (b, ki, n_groups + g))
    v_spec = pl.BlockSpec((1, t, gw),
                          lambda b, g, qi, ki: (b, ki, 2 * n_groups + g))
    o_spec = pl.BlockSpec((1, t, gw), lambda b, g, qi, ki: (b, qi, g))

    return pl.pallas_call(
        kernel,
        out_shape=jax.ShapeDtypeStruct((B, Np, C), qkv.dtype),
        grid_spec=pltpu.PrefetchScalarGridSpec(
            num_scalar_prefetch=0,
            grid=(B, n_groups, Np // t, Np // t),
            in_specs=[q_spec, k_spec, v_spec],
            out_specs=o_spec,
            scratch_shapes=[
                pltpu.VMEM((G, t, 1), jnp.float32),    # running max per head
                pltpu.VMEM((G, t, 1), jnp.float32),    # running denom per head
                pltpu.VMEM((G, t, hd), jnp.float32),   # f32 output accumulator
            ],
        ),
        compiler_params=pltpu.CompilerParams(
            dimension_semantics=("parallel", "parallel", "parallel",
                                 "arbitrary")),
    )(qkv, qkv, qkv)


# ---------------------------------------------------------------------------
# Full Attention forward.
# ---------------------------------------------------------------------------
def attention_pallas(x, w_qkv, b_qkv, w_proj, b_proj, *, num_heads,
                     tile_seq=128, tile_m=256):
    """x: (B, N, C). w_qkv: (C, 3C), b_qkv: (3C,) or None, w_proj: (C, C),
    b_proj: (C,).  Weights are (in, out), transposed vs. PyTorch nn.Linear."""
    B, N, C = x.shape
    H = num_heads
    assert C % H == 0, "dim should be divisible by num_heads"
    hd = C // H
    scale = hd ** (-0.5)

    # Pad the sequence up to the attention tile (pad-and-mask; no divisor
    # shrinking).  Padded kv columns are masked with -inf inside the kernel;
    # padded query rows are sliced off at the end.
    t = min(tile_seq, _round_up(N, 8))
    Np = _round_up(N, t)
    if Np != N:
        x = jnp.pad(x, ((0, 0), (0, Np - N), (0, 0)))
    M = B * Np

    # 1) QKV projection (bias DMA + add skipped entirely when qkv_bias=False).
    qkv = linear_pallas(x.reshape(M, C), w_qkv, b_qkv, tile_m=tile_m)
    qkv = qkv.reshape(B, Np, 3 * C)

    # 2) Flash attention reads q/k/v blocks straight from the (B, Np, 3C)
    #    activation and writes a token-major (B, Np, C) output -> no HBM
    #    transpose passes between the three kernels.
    o = flash_attention_pallas(qkv, num_heads=H, head_dim=hd, seq_len=N,
                               tile_seq=t, scale=scale)

    # 3) Output projection.
    y = linear_pallas(o.reshape(M, C), w_proj, b_proj, tile_m=tile_m)
    y = y.reshape(B, Np, C)
    return y[:, :N] if Np != N else y


def attention_reference(x, w_qkv, b_qkv, w_proj, b_proj, *, num_heads):
    B, N, C = x.shape
    hd = C // num_heads
    qkv = jnp.einsum("bnc,cd->bnd", x, w_qkv)
    if b_qkv is not None:
        qkv = qkv + b_qkv
    qkv = qkv.reshape(B, N, 3, num_heads, hd).transpose(2, 0, 3, 1, 4)
    q, k, v = qkv[0], qkv[1], qkv[2]
    attn = jax.nn.softmax(
        jnp.einsum("bhqd,bhkd->bhqk", q, k) * (hd ** (-0.5)), axis=-1)
    o = jnp.einsum("bhqk,bhkd->bhqd", attn, v)
    o = o.transpose(0, 2, 1, 3).reshape(B, N, C)
    return jnp.einsum("bnc,cd->bnd", o, w_proj) + b_proj


if __name__ == "__main__":
    # Small shapes that still exercise the interesting paths: N=100 is not
    # tile-aligned (-> pad + kv mask), head_dim=64 (-> heads grouped so the
    # attention blocks stay 128-lane dense).
    B, N = 2, 100
    dim = 256
    num_heads = 4            # head_dim = 64

    key = jax.random.PRNGKey(0)
    kx, kq, kp, kb = jax.random.split(key, 4)

    x = jax.random.normal(kx, (B, N, dim), dtype=jnp.float32)
    # Weights stored (in, out), i.e. transposed vs. PyTorch nn.Linear.
    w_qkv = jax.random.normal(kq, (dim, 3 * dim), jnp.float32) * 0.05
    b_qkv = None                                        # qkv_bias=False
    w_proj = jax.random.normal(kp, (dim, dim), jnp.float32) * 0.05
    b_proj = jax.random.normal(kb, (dim,), jnp.float32) * 0.05

    y = attention_pallas(x, w_qkv, b_qkv, w_proj, b_proj, num_heads=num_heads)
    y = jax.block_until_ready(y)

    y_ref = attention_reference(x, w_qkv, b_qkv, w_proj, b_proj,
                                num_heads=num_heads)
    assert y.shape == (B, N, dim)
    assert jnp.allclose(y, y_ref, atol=5e-3, rtol=5e-3), (
        "mismatch vs reference, max abs err = "
        f"{float(jnp.max(jnp.abs(y - y_ref)))}")

    print("KERNEL_OK")
</pallas_src>

<mosaic_0001>
module attributes {stable_mosaic.version = 11 : i64} {
  func.func @_linear_kernel(%arg0: i32, %arg1: i32, %arg2: memref<208x256xf32, #tpu.memory_space<vmem>>, %arg3: memref<256x384xf32, #tpu.memory_space<vmem>>, %arg4: memref<208x384xf32, #tpu.memory_space<vmem>>) attributes {dimension_semantics = [#tpu.dimension_semantics<parallel>, #tpu.dimension_semantics<parallel>], iteration_bounds = array<i64: 1, 2>, scalar_prefetch = 0 : i64, scratch_operands = 0 : i64, tpu.core_type = #tpu.core_type<tc>, window_params = [{transform_indices = @transform_0, window_bounds = array<i64: 208, 256>}, {transform_indices = @transform_1, window_bounds = array<i64: 256, 384>}, {transform_indices = @transform_2, window_bounds = array<i64: 208, 384>}]} {
    %c0 = arith.constant 0 : index
    %c0_0 = arith.constant 0 : index
    %0 = vector.load %arg2[%c0, %c0_0] : memref<208x256xf32, #tpu.memory_space<vmem>>, vector<208x256xf32>
    %c0_1 = arith.constant 0 : index
    %c0_2 = arith.constant 0 : index
    %1 = vector.load %arg3[%c0_1, %c0_2] : memref<256x384xf32, #tpu.memory_space<vmem>>, vector<256x384xf32>
    %cst = arith.constant dense<0.000000e+00> : vector<208x384xf32>
    %2 = tpu.matmul %0, %1, %cst {dimension_numbers = #tpu.dot_dimension_numbers<[1], [0], [0], [1], [0, 0, 1, 1], [], []>} : vector<208x256xf32>, vector<256x384xf32>, vector<208x384xf32> -> vector<208x384xf32>
    %c0_3 = arith.constant 0 : index
    %c0_4 = arith.constant 0 : index
    %3 = vector.load %arg4[%c0_3, %c0_4] : memref<208x384xf32, #tpu.memory_space<vmem>>, vector<208x384xf32>
    tpu.vector_store %arg4[%c0_3, %c0_4], %2 {strides = array<i32>} : memref<208x384xf32, #tpu.memory_space<vmem>>, vector<208x384xf32>,
    return
  }
  func.func @transform_0(%arg0: i32, %arg1: i32) -> (i32, i32) {
    %c0_i32 = arith.constant 0 : i32
    %c0_i32_0 = arith.constant 0 : i32
    return %arg0, %c0_i32 : i32, i32
  }
  func.func @transform_1(%arg0: i32, %arg1: i32) -> (i32, i32) {
    %c0_i32 = arith.constant 0 : i32
    %c0_i32_0 = arith.constant 0 : i32
    return %c0_i32, %arg1 : i32, i32
  }
  func.func @transform_2(%arg0: i32, %arg1: i32) -> (i32, i32) {
    %c0_i32 = arith.constant 0 : i32
    return %arg0, %arg1 : i32, i32
  }
}

</mosaic_0001>

<bundles_post_ra>
// kernel: tpu_custom_call.1
= control target key start
LH: loop header
LB: loop body
LE: loop exit
PB: predicated region body
PF: predicated region fallthrough
CT: control target
= control target key end

     0   :  { %7 = vsyncpa [#allocation3], 0  ;;  %s1621_s0 = inlined_call_operand.hbm [shape: f32[208,256], index: 0, kind: input, shape index: {}]   ;;  %s1622_s1 = inlined_call_operand.hbm [shape: f32[256,768], index: 1, kind: input, shape index: {}]   ;;  %s1623_s2 = inlined_call_operand.hbm [shape: f32[208,768], index: 2, kind: output, shape index: {}]  }
   0x1   :  { %8 = vsyncpa [#allocation6], 0 }
   0x2   :  { %10 = vsyncpa [#allocation6 + $0x1], 0 }
   0x3   :  { %11 = vsyncpa [#allocation4], 0 }
   0x4   :  { %13 = vsyncpa [#allocation4 + $0x1], 0  ;;  %s1226_s9 = smov 0   ;;  %s1228_s10 = smov 0  }
   0x5   :  { %s1230_s11 = smov 0   ;;  %s1232_s12 = smov 0  }
   0x6   :  { %s1234_s13 = smov 0   ;;  %s1236_s14 = smov 0  }
   0x7 LB: > { %1631 = sst [smem:[#allocation11_spill]] %s1197_s14  ;;  %s961_s15 = sadd.s32 4294967295, %s1197_s14   ;;  %s1197_s14 = sphi %s1236_s14, %s19_s14   ;;  %s1193_s13 = sphi %s1234_s13, %s1654_s13   ;;  %s1189_s12 = sphi %s1232_s12, %s1653_s12   ;;  %s1185_s11 = sphi %s1230_s11, %s1652_s11   ;;  %s1181_s10 = sphi %s1228_s10, %s1651_s10   ;;  %s1177_s9 = sphi %s1226_s9, %s1650_s9  }
   0x8   : > { %s962_s16 = sadd.s32 4294967294, %s1197_s14   ;;  %p71_p0 = scmp.ne.s32.totalorder %s1185_s11, %s1181_s10 }
   0x9   : > { %p72_p1 = scmp.eq.s32.totalorder %s1197_s14, 0  ;;  %p77_p2 = scmp.ne.s32.totalorder %s1181_s10, %s1177_s9 }
   0xa   : > { %p1264_p3 = scmp.eq.s32.totalorder %s961_s15, 0  ;;  %p103_p4 = scmp.eq.s32.totalorder %s961_s15, 1 }
   0xb   : > { %p1268_p5 = por %p72_p1, %p71_p0  ;;  %p109_p6 = scmp.eq.s32.totalorder %s962_s16, 1 }
   0xc   : > { %s1632_s18 = scalar_select %p1264_p3, 1, 0 }
   0xd   : > { %p1274_p7 = por %p1264_p3, %p77_p2  ;;  %p1278_p8 = por %p103_p4, %p71_p0 }
   0xe   : > { %p1282_p9 = por %p109_p6, %p77_p2  ;;  %p963_p10 = scmp.ge.s32.totalorder %s1197_s14, 1 }
   0xf   : > { %s1634_s20 = scalar_select %p1274_p7, 1, 0 }
  0x10   : > { %s1635_s21 = scalar_select %p1278_p8, 1, 0 }
  0x11   : > { %s1636_s22 = scalar_select %p1282_p9, 1, 0 }
  0x12   : > { %p116_p11 = scmp.lt.s32.totalorder %s1197_s14, 3  ;;  %s1199_s24 = smov [#allocation2]  }
  0x13   : > { %1637 = sst [smem:[#allocation12_spill]] %s1636_s22  ;;  %s132_s25 = sshll.u32 %s1199_s24, 4  ;;  %s133_s25 = int_to_ptr.vmem [resolvable:$true] %s132_s25 }
  0x14   : > { %p1288_p12 = pnand %p963_p10, %p116_p11  ;;  %p998_p1 = scmp.lt.s32.totalorder %s1197_s14, 2 }
  0x15   : > { %s28_s28 = sadd.s32 1, %s1193_s13  ;;  %s1070_s30 = scalar_lea.vmem %s133_s25, 6656 }
  0x16   : > { %p985_p13 = pneg %p1288_p12  ;;  %p1304_p2 = pnand %p998_p1, %p1268_p5 }
  0x17   : > { %p1309_p6 = scmp.ge.s32.totalorder %s28_s28, 2  ;;  %p1071_p11 = scmp.ne.s32.totalorder %s133_s25, %s1070_s30 }
  0x18   : > { %p1298_p4 = pnand %p985_p13, %p1264_p3  ;;  %p1078_p9 = scmp.lt.s32.totalorder %s133_s25, %s133_s25 }
  0x19   : > { %p1079_p8 = scmp.lt.s32.totalorder %s1070_s30, %s1070_s30 }
  0x1a   : > { %p1061_p10 = pneg %p1298_p4 }
  0x1b   : > { %p1080_p7 = por %p1079_p8, %p1078_p9 }
  0x1c   : > { %p1073_p0 = pnand %p1071_p11, %p1061_p10 }
  0x1e   : > { %p1074_p13 = pneg %p1073_p0 }
  0x20   : > { %p1081_p3 = pnand %p1080_p7, %p1074_p13 }
  0x22   : > { %1084 = shalt.err (!%p1081_p3)
}
  0x23   : > { %s1200_s3 = smov 256   ;;  %s1201_s4 = smov 16  }
  0x24   : > { %988 = dma.hbm_to_vmem [thread:$0]  (!%p1298_p4), %s1621_s0, 6656, %s133_s25, [#allocation3], %s1200_s3, %s1200_s3, %s1201_s4  }
  0x25   : > { %s146_s7 = sand.u32 1, %s1185_s11   ;;  %s1656_s28 = smov (%p1309_p6, %s28_s28), 0 }
  0x26   : > { %s974_s8 = smul.u32 768, %s146_s7  ;;  %s61_s15 = ssub.s32 %s1193_s13, %s1656_s28 }
  0x27   : > { %s972_s16 = smul.u32 384, %s1193_s13  ;;  %p62_p3 = scmp.eq.s32.totalorder %s61_s15, 0 }
  0x28   : > { %s150_s17 = scalar_lea.vmem [#allocation5], %s974_s8  ;;  %s1642_s26 = sadd.s32 1, %s1185_s11 }
  0x29   : > { %s156_s30 = scalar_lea.hbm %s1622_s1, %s972_s16  ;;  %s157_s14 = sshll.u32 %s150_s17, 4  ;;  %s158_s14 = int_to_ptr.vmem [resolvable:$true] %s157_s14 }
  0x2a   : > { %s1334_s22 = scalar_select %p62_p3, %s1185_s11, %s1642_s26  }
  0x2b   : > { %s147_s25 = scalar_lea.sflag [#allocation6], %s146_s7  ;;  %p1087_p5 = pneg %p1304_p2 }
  0x2c   : > { %s1098_s29 = scalar_lea.vmem %s158_s14, 12288  ;;  %s1202_s3 = smov [#allocation5]  }
  0x2d   : > { %p1099_p7 = scmp.ne.s32.totalorder %s158_s14, %s1098_s29  ;;  %s1103_s4 = sshll.u32 %s1202_s3, 4  ;;  %s1104_s4 = int_to_ptr.vmem [resolvable:$false] %s1103_s4 }
  0x2e   : > { %s1105_s5 = scalar_lea.vmem %s1104_s4, 24576  ;;  %p1106_p0 = scmp.lt.s32.totalorder %s158_s14, %s1104_s4 }
  0x2f   : > { %p1101_p8 = pnand %p1099_p7, %p1087_p5  ;;  %p1107_p1 = scmp.lt.s32.totalorder %s1105_s5, %s1098_s29 }
  0x31   : > { %p1102_p9 = pneg %p1101_p8  ;;  %p1108_p4 = por %p1107_p1, %p1106_p0 }
  0x33   : > { %p1109_p6 = pnand %p1108_p4, %p1102_p9 }
  0x35   : > { %1112 = shalt.err (!%p1109_p6)
}
  0x36   : > { %s1203_s17 = smov 768   ;;  %s1204_s6 = smov 384  }
  0x37   : > { %s1205_s8 = smov 24   ;;  %169 = sbr.rel (%p1288_p12) target bundleno = 442 (0x1ba), region = 28 }
  0x38   : > { %992 = dma.hbm_to_vmem [thread:$0]  (!%p1304_p2), %s156_s30, 12288, %s158_s14, %s147_s25, %s1203_s17, %s1204_s6, %s1205_s8  }
  0x39   : > { %p1643_p10 = scmp.ne.s32.totalorder (!%p1288_p12), %s1632_s18, 0 }
  0x3c   : > { %1164 = dma.done.wait (%p1643_p10), [#allocation3], 6656  }
  0x3d   : > { %1166 = vsyncadd (%p1643_p10), [#allocation3], 4294960640  ;;  %s1347_s7 = sand.u32 1, %s1181_s10   ;;  %p1644_p2 = scmp.ne.s32.totalorder %s1634_s20, 0 }
  0x3e   : > { %s975_s15 = smul.u32 768, %s1347_s7  ;;  %s176_s16 = scalar_lea.sflag [#allocation6], %s1347_s7 }
  0x40   : > { %s1351_s19 = scalar_lea.vmem [#allocation5], %s975_s15 }
  0x41   : > { %1168 = dma.done.wait (%p1644_p2), %s176_s16, 12288  }
  0x42   : > { %1170 = vsyncadd (%p1644_p2), %s176_s16, 4294955008  ;;  %v1206_v0 = vmov 0.0   ;;  %v302_v1 = vld [vmem:[%s1351_s19 + $0x170] sm:$0xff]  ;;  %v301_v2 = vld [vmem:[%s1351_s19 + $0x168] sm:$0xff]  ;;  %s976_s14 = smul.u32 624, %s1347_s7  ;;  %p1645_p11 = scmp.ne.s32.totalorder %s1635_s21, 0 }
  0x43   : > { %573 = vmatprep.subr.mxu1 %v1206_v0  ;;  %v303_v3 = vld [vmem:[%s1351_s19 + $0x178] sm:$0xff]  ;;  %352 = vmatprep.subr.mxu0 %v302_v1  ;;  %v298_v5 = vld [vmem:[%s1351_s19 + $0x150] sm:$0xff]  ;;  %v300_v6 = vld [vmem:[%s1351_s19 + $0x160] sm:$0xff]  ;;  %s973_s20 = smul.u32 384, %s1189_s12  ;;  %s847_s12 = scalar_lea.sflag [#allocation4], %s1347_s7 }
  0x44   : > { %574 = vmatpush1.msra.mxu1 %v303_v3  ;;  %v299_v4 = vld [vmem:[%s1351_s19 + $0x158] sm:$0xff]  ;;  %353 = vmatpush1.msra.mxu0 %v301_v2  ;;  %v296_v7 = vld [vmem:[%s1351_s19 + $0x140] sm:$0xff]  ;;  %v297_v8 = vld [vmem:[%s1351_s19 + $0x148] sm:$0xff]  ;;  %s1486_s18 = scalar_lea.vmem [#allocation7], %s976_s14  ;;  %s1207_s25 = smov [#allocation7]  }
  0x45   : > { %575 = vmatprep.subr.mxu1 %v1206_v0  ;;  %354 = vmatprep.subr.mxu0 %v299_v4  ;;  %v295_v9 = vld [vmem:[%s1351_s19 + $0x138] sm:$0xff]  ;;  %v293_v10 = vld [vmem:[%s1351_s19 + $0x128] sm:$0xff]  ;;  %v294_v11 = vld [vmem:[%s1351_s19 + $0x130] sm:$0xff]  ;;  %s863_s23 = sshll.u32 %s1486_s18, 4  ;;  %s1568_s30 = scalar_lea.hbm %s1623_s2, %s973_s20  ;;  %s1570_s23 = int_to_ptr.vmem [resolvable:$true] %s863_s23 }
  0x46   : > { %576 = vmatpush1.msra.mxu1 %v300_v6  ;;  %355 = vmatpush1.msra.mxu0 %v298_v5  ;;  %v292_v12 = vld [vmem:[%s1351_s19 + $0x120] sm:$0xff]  ;;  %v290_v13 = vld [vmem:[%s1351_s19 + $0x110] sm:$0xff]  ;;  %v291_v14 = vld [vmem:[%s1351_s19 + $0x118] sm:$0xff]  ;;  %s1113_s26 = scalar_lea.vmem %s1570_s23, 9984  ;;  %s1117_s29 = sshll.u32 %s1207_s25, 4  ;;  %s1118_s29 = int_to_ptr.vmem [resolvable:$false] %s1117_s29 }
  0x47   : > { %577 = vmatprep.subr.mxu1 %v1206_v0  ;;  %356 = vmatprep.subr.mxu0 %v296_v7  ;;  %v289_v15 = vld [vmem:[%s1351_s19 + $0x108] sm:$0xff]  ;;  %v287_v16 = vld [vmem:[%s1351_s19 + $0xf8] sm:$0xff]  ;;  %v288_v17 = vld [vmem:[%s1351_s19 + $0x100] sm:$0xff]  ;;  %p1114_p12 = scmp.ne.s32.totalorder %s1570_s23, %s1113_s26  ;;  %s1119_s3 = scalar_lea.vmem %s1118_s29, 19968 }
  0x48   : > { %578 = vmatpush1.msra.mxu1 %v297_v8  ;;  %357 = vmatpush1.msra.mxu0 %v295_v9  ;;  %v286_v18 = vld [vmem:[%s1351_s19 + $0xf0] sm:$0xff]  ;;  %v284_v19 = vld [vmem:[%s1351_s19 + $0xe0] sm:$0xff]  ;;  %v285_v20 = vld [vmem:[%s1351_s19 + $0xe8] sm:$0xff]  ;;  %p1120_p5 = scmp.lt.s32.totalorder %s1570_s23, %s1118_s29  ;;  %p1121_p7 = scmp.lt.s32.totalorder %s1119_s3, %s1113_s26 }
  0x49   : > { %579 = vmatprep.subr.mxu1 %v1206_v0  ;;  %358 = vmatprep.subr.mxu0 %v293_v10  ;;  %v283_v21 = vld [vmem:[%s1351_s19 + $0xd8] sm:$0xff]  ;;  %v281_v22 = vld [vmem:[%s1351_s19 + $0xc8] sm:$0xff]  ;;  %v282_v23 = vld [vmem:[%s1351_s19 + $0xd0] sm:$0xff]  ;;  %p1115_p13 = pnand %p1114_p12, %p1645_p11 }
  0x4a   : > { %580 = vmatpush1.msra.mxu1 %v294_v11  ;;  %359 = vmatpush1.msra.mxu0 %v292_v12  ;;  %v280_v24 = vld [vmem:[%s1351_s19 + $0xc0] sm:$0xff]  ;;  %v278_v25 = vld [vmem:[%s1351_s19 + $0xb0] sm:$0xff]  ;;  %v279_v26 = vld [vmem:[%s1351_s19 + $0xb8] sm:$0xff]  ;;  %p1122_p8 = por %p1121_p7, %p1120_p5 }
  0x4b   : > { %581 = vmatprep.subr.mxu1 %v1206_v0  ;;  %360 = vmatprep.subr.mxu0 %v290_v13  ;;  %v277_v27 = vld [vmem:[%s1351_s19 + $0xa8] sm:$0xff]  ;;  %v275_v28 = vld [vmem:[%s1351_s19 + $0x98] sm:$0xff]  ;;  %v276_v29 = vld [vmem:[%s1351_s19 + $0xa0] sm:$0xff]  ;;  %p1116_p3 = pneg %p1115_p13 }
  0x4c   : > { %582 = vmatpush1.msra.mxu1 %v291_v14  ;;  %361 = vmatpush1.msra.mxu0 %v289_v15  ;;  %v274_v30 = vld [vmem:[%s1351_s19 + $0x90] sm:$0xff]  ;;  %v272_v31 = vld [vmem:[%s1351_s19 + $0x80] sm:$0xff]  ;;  %v273_v32 = vld [vmem:[%s1351_s19 + $0x88] sm:$0xff] }
  0x4d   : > { %583 = vmatprep.subr.mxu1 %v1206_v0  ;;  %362 = vmatprep.subr.mxu0 %v287_v16  ;;  %v271_v33 = vld [vmem:[%s1351_s19 + $0x78] sm:$0xff]  ;;  %v269_v34 = vld [vmem:[%s1351_s19 + $0x68] sm:$0xff]  ;;  %v270_v35 = vld [vmem:[%s1351_s19 + $0x70] sm:$0xff]  ;;  %p1123_p9 = pnand %p1122_p8, %p1116_p3 }
  0x4e   : > { %584 = vmatpush1.msra.mxu1 %v288_v17  ;;  %363 = vmatpush1.msra.mxu0 %v286_v18  ;;  %v268_v36 = vld [vmem:[%s1351_s19 + $0x60] sm:$0xff]  ;;  %v266_v37 = vld [vmem:[%s1351_s19 + $0x50] sm:$0xff]  ;;  %v267_v38 = vld [vmem:[%s1351_s19 + $0x58] sm:$0xff] }
  0x4f   : > { %585 = vmatprep.subr.mxu1 %v1206_v0  ;;  %364 = vmatprep.subr.mxu0 %v284_v19  ;;  %v265_v39 = vld [vmem:[%s1351_s19 + $0x48] sm:$0xff]  ;;  %v263_v40 = vld [vmem:[%s1351_s19 + $0x38] sm:$0xff]  ;;  %v264_v41 = vld [vmem:[%s1351_s19 + $0x40] sm:$0xff] }
  0x50   : > { %586 = vmatpush1.msra.mxu1 %v285_v20  ;;  %365 = vmatpush1.msra.mxu0 %v283_v21  ;;  %v262_v42 = vld [vmem:[%s1351_s19 + $0x30] sm:$0xff]  ;;  %v260_v43 = vld [vmem:[%s1351_s19 + $0x20] sm:$0xff]  ;;  %v261_v44 = vld [vmem:[%s1351_s19 + $0x28] sm:$0xff] }
  0x51   : > { %587 = vmatprep.subr.mxu1 %v1206_v0  ;;  %366 = vmatprep.subr.mxu0 %v281_v22  ;;  %v259_v45 = vld [vmem:[%s1351_s19 + $0x18] sm:$0xff]  ;;  %v257_v46 = vld [vmem:[%s1351_s19 + $0x8] sm:$0xff]  ;;  %v258_v47 = vld [vmem:[%s1351_s19 + $0x10] sm:$0xff] }
  0x52   : > { %588 = vmatpush1.msra.mxu1 %v282_v23  ;;  %367 = vmatpush1.msra.mxu0 %v280_v24  ;;  %v256_v48 = vld [vmem:[%s1351_s19] sm:$0xff]  ;;  %v350_v49 = vld [vmem:[%s1351_s19 + $0x2f0] sm:$0xff]  ;;  %v351_v50 = vld [vmem:[%s1351_s19 + $0x2f8] sm:$0xff] }
  0x53   : > { %589 = vmatprep.subr.mxu1 %v1206_v0  ;;  %368 = vmatprep.subr.mxu0 %v278_v25  ;;  %v349_v51 = vld [vmem:[%s1351_s19 + $0x2e8] sm:$0xff]  ;;  %v347_v52 = vld [vmem:[%s1351_s19 + $0x2d8] sm:$0xff]  ;;  %v348_v53 = vld [vmem:[%s1351_s19 + $0x2e0] sm:$0xff] }
  0x54   : > { %590 = vmatpush1.msra.mxu1 %v279_v26  ;;  %369 = vmatpush1.msra.mxu0 %v277_v27  ;;  %v346_v54 = vld [vmem:[%s1351_s19 + $0x2d0] sm:$0xff]  ;;  %v344_v55 = vld [vmem:[%s1351_s19 + $0x2c0] sm:$0xff]  ;;  %v345_v56 = vld [vmem:[%s1351_s19 + $0x2c8] sm:$0xff] }
  0x55   : > { %591 = vmatprep.subr.mxu1 %v1206_v0  ;;  %370 = vmatprep.subr.mxu0 %v275_v28  ;;  %v343_v57 = vld [vmem:[%s1351_s19 + $0x2b8] sm:$0xff]  ;;  %v341_v58 = vld [vmem:[%s1351_s19 + $0x2a8] sm:$0xff]  ;;  %v342_v59 = vld [vmem:[%s1351_s19 + $0x2b0] sm:$0xff] }
  0x56   : > { %592 = vmatpush1.msra.mxu1 %v276_v29  ;;  %371 = vmatpush1.msra.mxu0 %v274_v30  ;;  %v340_v60 = vld [vmem:[%s1351_s19 + $0x2a0] sm:$0xff]  ;;  %v338_v61 = vld [vmem:[%s1351_s19 + $0x290] sm:$0xff]  ;;  %v339_v62 = vld [vmem:[%s1351_s19 + $0x298] sm:$0xff] }
  0x57   : > { %593 = vmatprep.subr.mxu1 %v1206_v0  ;;  %372 = vmatprep.subr.mxu0 %v272_v31  ;;  %v337_v63 = vld [vmem:[%s1351_s19 + $0x288] sm:$0xff]  ;;  %v335_v1 = vld [vmem:[%s1351_s19 + $0x278] sm:$0xff]  ;;  %v336_v2 = vld [vmem:[%s1351_s19 + $0x280] sm:$0xff] }
  0x58   : > { %594 = vmatpush1.msra.mxu1 %v273_v32  ;;  %373 = vmatpush1.msra.mxu0 %v271_v33  ;;  %v334_v3 = vld [vmem:[%s1351_s19 + $0x270] sm:$0xff]  ;;  %v332_v4 = vld [vmem:[%s1351_s19 + $0x260] sm:$0xff]  ;;  %v333_v5 = vld [vmem:[%s1351_s19 + $0x268] sm:$0xff] }
  0x59   : > { %595 = vmatprep.subr.mxu1 %v1206_v0  ;;  %374 = vmatprep.subr.mxu0 %v269_v34  ;;  %v331_v6 = vld [vmem:[%s1351_s19 + $0x258] sm:$0xff]  ;;  %v329_v7 = vld [vmem:[%s1351_s19 + $0x248] sm:$0xff]  ;;  %v330_v8 = vld [vmem:[%s1351_s19 + $0x250] sm:$0xff] }
  0x5a   : > { %596 = vmatpush1.msra.mxu1 %v270_v35  ;;  %375 = vmatpush1.msra.mxu0 %v268_v36  ;;  %v328_v9 = vld [vmem:[%s1351_s19 + $0x240] sm:$0xff]  ;;  %v326_v10 = vld [vmem:[%s1351_s19 + $0x230] sm:$0xff]  ;;  %v327_v11 = vld [vmem:[%s1351_s19 + $0x238] sm:$0xff] }
  0x5b   : > { %597 = vmatprep.subr.mxu1 %v1206_v0  ;;  %376 = vmatprep.subr.mxu0 %v266_v37  ;;  %v325_v12 = vld [vmem:[%s1351_s19 + $0x228] sm:$0xff]  ;;  %v323_v13 = vld [vmem:[%s1351_s19 + $0x218] sm:$0xff]  ;;  %v324_v14 = vld [vmem:[%s1351_s19 + $0x220] sm:$0xff] }
  0x5c   : > { %598 = vmatpush1.msra.mxu1 %v267_v38  ;;  %377 = vmatpush1.msra.mxu0 %v265_v39  ;;  %v322_v15 = vld [vmem:[%s1351_s19 + $0x210] sm:$0xff]  ;;  %v320_v16 = vld [vmem:[%s1351_s19 + $0x200] sm:$0xff]  ;;  %v321_v17 = vld [vmem:[%s1351_s19 + $0x208] sm:$0xff] }
  0x5d   : > { %599 = vmatprep.subr.mxu1 %v1206_v0  ;;  %378 = vmatprep.subr.mxu0 %v263_v40  ;;  %v319_v18 = vld [vmem:[%s1351_s19 + $0x1f8] sm:$0xff]  ;;  %v317_v19 = vld [vmem:[%s1351_s19 + $0x1e8] sm:$0xff]  ;;  %v318_v20 = vld [vmem:[%s1351_s19 + $0x1f0] sm:$0xff] }
  0x5e   : > { %600 = vmatpush1.msra.mxu1 %v264_v41  ;;  %379 = vmatpush1.msra.mxu0 %v262_v42  ;;  %v316_v21 = vld [vmem:[%s1351_s19 + $0x1e0] sm:$0xff]  ;;  %v314_v22 = vld [vmem:[%s1351_s19 + $0x1d0] sm:$0xff]  ;;  %v315_v23 = vld [vmem:[%s1351_s19 + $0x1d8] sm:$0xff] }
  0x5f   : > { %601 = vmatprep.subr.mxu1 %v1206_v0  ;;  %380 = vmatprep.subr.mxu0 %v260_v43  ;;  %v313_v24 = vld [vmem:[%s1351_s19 + $0x1c8] sm:$0xff]  ;;  %v311_v25 = vld [vmem:[%s1351_s19 + $0x1b8] sm:$0xff]  ;;  %v312_v26 = vld [vmem:[%s1351_s19 + $0x1c0] sm:$0xff] }
  0x60   : > { %602 = vmatpush1.msra.mxu1 %v261_v44  ;;  %381 = vmatpush1.msra.mxu0 %v259_v45  ;;  %v310_v27 = vld [vmem:[%s1351_s19 + $0x1b0] sm:$0xff]  ;;  %v308_v28 = vld [vmem:[%s1351_s19 + $0x1a0] sm:$0xff]  ;;  %v309_v29 = vld [vmem:[%s1351_s19 + $0x1a8] sm:$0xff] }
  0x61   : > { %603 = vmatprep.subr.mxu1 %v1206_v0  ;;  %382 = vmatprep.subr.mxu0 %v257_v46  ;;  %v307_v30 = vld [vmem:[%s1351_s19 + $0x198] sm:$0xff]  ;;  %v305_v31 = vld [vmem:[%s1351_s19 + $0x188] sm:$0xff]  ;;  %v304_v33 = vld [vmem:[%s1351_s19 + $0x180] sm:$0xff] }
  0x62   : > { %604 = vmatpush1.msra.mxu1 %v258_v47  ;;  %383 = vmatpush1.msra.mxu0 %v256_v48  ;;  %v205_v32 = vld [vmem:[#allocation2 + $0x8] sm:$0xff]  ;;  %v306_v34 = vld [vmem:[%s1351_s19 + $0x190] sm:$0xff]  ;;  %v204_v35 = vld [vmem:[#allocation2] sm:$0xff] }
  0x63   : > { %605 = vmatprep.subr.mxu1 %v1206_v0  ;;  %384 = vmatprep.subr.mxu0 %v350_v49  ;;  %v207_v36 = vld [vmem:[#allocation2 + $0x18] sm:$0xff]  ;;  %v206_v37 = vld [vmem:[#allocation2 + $0x10] sm:$0xff]  ;;  %v209_v38 = vld [vmem:[#allocation2 + $0x28] sm:$0xff] }
  0x64   : > { %606 = vmatpush2.msra.mxu1 %v351_v50  ;;  %385 = vmatpush2.msra.mxu0 %v349_v51  ;;  %v208_v39 = vld [vmem:[#allocation2 + $0x20] sm:$0xff]  ;;  %v211_v40 = vld [vmem:[#allocation2 + $0x38] sm:$0xff]  ;;  %v213_v41 = vld [vmem:[#allocation2 + $0x48] sm:$0xff] }
  0x65   : > { %607 = vmatprep.subr.mxu1 %v1206_v0  ;;  %386 = vmatprep.subr.mxu0 %v347_v52  ;;  %v212_v42 = vld [vmem:[#allocation2 + $0x40] sm:$0xff]  ;;  %v215_v43 = vld [vmem:[#allocation2 + $0x58] sm:$0xff]  ;;  %v214_v44 = vld [vmem:[#allocation2 + $0x50] sm:$0xff] }
  0x66   : > { %608 = vmatpush2.msra.mxu1 %v348_v53  ;;  %387 = vmatpush2.msra.mxu0 %v346_v54  ;;  %v217_v45 = vld [vmem:[#allocation2 + $0x68] sm:$0xff]  ;;  %v216_v46 = vld [vmem:[#allocation2 + $0x60] sm:$0xff]  ;;  %v219_v47 = vld [vmem:[#allocation2 + $0x78] sm:$0xff] }
  0x67   : > { %609 = vmatprep.subr.mxu1 %v1206_v0  ;;  %388 = vmatprep.subr.mxu0 %v344_v55  ;;  %v218_v48 = vld [vmem:[#allocation2 + $0x70] sm:$0xff]  ;;  %v221_v49 = vld [vmem:[#allocation2 + $0x88] sm:$0xff]  ;;  %v220_v50 = vld [vmem:[#allocation2 + $0x80] sm:$0xff] }
  0x68   : > { %610 = vmatpush2.msra.mxu1 %v345_v56  ;;  %389 = vmatpush2.msra.mxu0 %v343_v57  ;;  %v223_v51 = vld [vmem:[#allocation2 + $0x98] sm:$0xff]  ;;  %v222_v52 = vld [vmem:[#allocation2 + $0x90] sm:$0xff]  ;;  %v225_v53 = vld [vmem:[#allocation2 + $0xa8] sm:$0xff] }
  0x69   : > { %611 = vmatprep.subr.mxu1 %v1206_v0  ;;  %390 = vmatprep.subr.mxu0 %v341_v58  ;;  %v224_v54 = vld [vmem:[#allocation2 + $0xa0] sm:$0xff]  ;;  %v227_v55 = vld [vmem:[#allocation2 + $0xb8] sm:$0xff]  ;;  %v226_v56 = vld [vmem:[#allocation2 + $0xb0] sm:$0xff] }
  0x6a   : > { %612 = vmatpush2.msra.mxu1 %v342_v59  ;;  %391 = vmatpush2.msra.mxu0 %v340_v60  ;;  %v229_v57 = vld [vmem:[#allocation2 + $0xc8] sm:$0xff]  ;;  %v228_v58 = vld [vmem:[#allocation2 + $0xc0] sm:$0xff]  ;;  %v231_v59 = vld [vmem:[#allocation2 + $0xd8] sm:$0xff] }
  0x6b   : > { %613 = vmatprep.subr.mxu1 %v1206_v0  ;;  %392 = vmatprep.subr.mxu0 %v338_v61  ;;  %v230_v60 = vld [vmem:[#allocation2 + $0xd0] sm:$0xff]  ;;  %v233_v61 = vld [vmem:[#allocation2 + $0xe8] sm:$0xff] }
  0x6c   : > { %614 = vmatpush2.msra.mxu1 %v339_v62  ;;  %393 = vmatpush2.msra.mxu0 %v337_v63  ;;  %v232_v62 = vld [vmem:[#allocation2 + $0xe0] sm:$0xff]  ;;  %v235_v63 = vld [vmem:[#allocation2 + $0xf8] sm:$0xff] }
  0x6d   : > { %615 = vmatprep.subr.mxu1 %v1206_v0  ;;  %394 = vmatprep.subr.mxu0 %v335_v1  ;;  %v234_v1 = vld [vmem:[#allocation2 + $0xf0] sm:$0xff] }
  0x6e   : > { %616 = vmatpush2.msra.mxu1 %v336_v2  ;;  %395 = vmatpush2.msra.mxu0 %v334_v3  ;;  %v237_v2 = vld [vmem:[#allocation2 + $0x108] sm:$0xff]  ;;  %v236_v3 = vld [vmem:[#allocation2 + $0x100] sm:$0xff] }
  0x6f   : > { %617 = vmatprep.subr.mxu1 %v1206_v0  ;;  %396 = vmatprep.subr.mxu0 %v332_v4  ;;  %v239_v4 = vld [vmem:[#allocation2 + $0x118] sm:$0xff] }
  0x70   : > { %618 = vmatpush2.msra.mxu1 %v333_v5  ;;  %397 = vmatpush2.msra.mxu0 %v331_v6  ;;  %v238_v5 = vld [vmem:[#allocation2 + $0x110] sm:$0xff]  ;;  %v241_v6 = vld [vmem:[#allocation2 + $0x128] sm:$0xff] }
  0x71   : > { %619 = vmatprep.subr.mxu1 %v1206_v0  ;;  %398 = vmatprep.subr.mxu0 %v329_v7  ;;  %v240_v7 = vld [vmem:[#allocation2 + $0x120] sm:$0xff] }
  0x72   : > { %620 = vmatpush2.msra.mxu1 %v330_v8  ;;  %399 = vmatpush2.msra.mxu0 %v328_v9  ;;  %v243_v8 = vld [vmem:[#allocation2 + $0x138] sm:$0xff]  ;;  %v242_v9 = vld [vmem:[#allocation2 + $0x130] sm:$0xff] }
  0x73   : > { %621 = vmatprep.subr.mxu1 %v1206_v0  ;;  %400 = vmatprep.subr.mxu0 %v326_v10  ;;  %v245_v10 = vld [vmem:[#allocation2 + $0x148] sm:$0xff] }
  0x74   : > { %622 = vmatpush2.msra.mxu1 %v327_v11  ;;  %401 = vmatpush2.msra.mxu0 %v325_v12  ;;  %v244_v11 = vld [vmem:[#allocation2 + $0x140] sm:$0xff]  ;;  %v247_v12 = vld [vmem:[#allocation2 + $0x158] sm:$0xff] }
  0x75   : > { %623 = vmatprep.subr.mxu1 %v1206_v0  ;;  %402 = vmatprep.subr.mxu0 %v323_v13  ;;  %v246_v13 = vld [vmem:[#allocation2 + $0x150] sm:$0xff] }
  0x76   : > { %624 = vmatpush2.msra.mxu1 %v324_v14  ;;  %403 = vmatpush2.msra.mxu0 %v322_v15  ;;  %v249_v14 = vld [vmem:[#allocation2 + $0x168] sm:$0xff]  ;;  %v248_v15 = vld [vmem:[#allocation2 + $0x160] sm:$0xff] }
  0x77   : > { %625 = vmatprep.subr.mxu1 %v1206_v0  ;;  %404 = vmatprep.subr.mxu0 %v320_v16  ;;  %v251_v16 = vld [vmem:[#allocation2 + $0x178] sm:$0xff] }
  0x78   : > { %626 = vmatpush2.msra.mxu1 %v321_v17  ;;  %405 = vmatpush2.msra.mxu0 %v319_v18  ;;  %v250_v17 = vld [vmem:[#allocation2 + $0x170] sm:$0xff]  ;;  %v253_v18 = vld [vmem:[#allocation2 + $0x188] sm:$0xff] }
  0x79   : > { %627 = vmatprep.subr.mxu1 %v1206_v0  ;;  %406 = vmatprep.subr.mxu0 %v317_v19  ;;  %v252_v19 = vld [vmem:[#allocation2 + $0x180] sm:$0xff] }
  0x7a   : > { %628 = vmatpush2.msra.mxu1 %v318_v20  ;;  %407 = vmatpush2.msra.mxu0 %v316_v21  ;;  %v255_v20 = vld [vmem:[#allocation2 + $0x198] sm:$0xff]  ;;  %v254_v21 = vld [vmem:[#allocation2 + $0x190] sm:$0xff] }
  0x7b   : > { %629 = vmatprep.subr.mxu1 %v1206_v0  ;;  %408 = vmatprep.subr.mxu0 %v314_v22 }
  0x7c   : > { %630 = vmatpush2.msra.mxu1 %v315_v23  ;;  %409 = vmatpush2.msra.mxu0 %v313_v24 }
  0x7d   : > { %631 = vmatprep.subr.mxu1 %v1206_v0  ;;  %410 = vmatprep.subr.mxu0 %v311_v25 }
  0x7e   : > { %632 = vmatpush2.msra.mxu1 %v312_v26  ;;  %411 = vmatpush2.msra.mxu0 %v310_v27 }
  0x7f   : > { %633 = vmatprep.subr.mxu1 %v1206_v0  ;;  %412 = vmatprep.subr.mxu0 %v308_v28 }
  0x80   : > { %634 = vmatpush2.msra.mxu1 %v309_v29  ;;  %413 = vmatpush2.msra.mxu0 %v307_v30 }
  0x81   : > { %635 = vmatprep.subr.mxu1 %v1206_v0  ;;  %414 = vmatprep.subr.mxu0 %v305_v31  ;;  %v210_v0 = vld [vmem:[#allocation2 + $0x30] sm:$0xff] }
  0x82   : > { %416 = vmatprep.mubr.f32.mxu0 %v205_v32  ;;  %415 = vmatpush2.msra.mxu0 %v304_v33 }
  0x83   : > { %636 = vmatpush2.msra.mxu1 %v306_v34  ;;  %637 = vmatprep.mubr.f32.mxu1 %v205_v32 }
  0x84   : > { %417 = vmatmul.mubr.f32.vlgmr.msra.gmra.mxu0 %v204_v35  ;;  %638 = vmatmul.mubr.f32.vlgmr.msra.gmra.mxu1 %v204_v35 }
  0x85   : > { %422 = vmatprep.mubr.f32.mxu0 %v207_v36  ;;  %642 = vmatprep.mubr.f32.mxu1 %v207_v36 }
  0x88   : > { %423 = vmatmul.mubr.f32.gmra.mxu0 %v206_v37  ;;  %643 = vmatmul.mubr.f32.gmra.mxu1 %v206_v37 }
  0x89   : > { %428 = vmatprep.mubr.f32.mxu0 %v209_v38  ;;  %647 = vmatprep.mubr.f32.mxu1 %v209_v38 }
  0x8c   : > { %429 = vmatmul.mubr.f32.gmra.mxu0 %v208_v39  ;;  %648 = vmatmul.mubr.f32.gmra.mxu1 %v208_v39 }
  0x8d   : > { %434 = vmatprep.mubr.f32.mxu0 %v211_v40  ;;  %652 = vmatprep.mubr.f32.mxu1 %v211_v40 }
  0x90   : > { %435 = vmatmul.mubr.f32.gmra.mxu0 %v210_v0  ;;  %653 = vmatmul.mubr.f32.gmra.mxu1 %v210_v0 }
  0x91   : > { %440 = vmatprep.mubr.f32.mxu0 %v213_v41  ;;  %657 = vmatprep.mubr.f32.mxu1 %v213_v41 }
  0x94   : > { %441 = vmatmul.mubr.f32.gmra.mxu0 %v212_v42  ;;  %658 = vmatmul.mubr.f32.gmra.mxu1 %v212_v42 }
  0x95   : > { %446 = vmatprep.mubr.f32.mxu0 %v215_v43  ;;  %662 = vmatprep.mubr.f32.mxu1 %v215_v43 }
  0x98   : > { %447 = vmatmul.mubr.f32.gmra.mxu0 %v214_v44  ;;  %663 = vmatmul.mubr.f32.gmra.mxu1 %v214_v44 }
  0x99   : > { %452 = vmatprep.mubr.f32.mxu0 %v217_v45  ;;  %667 = vmatprep.mubr.f32.mxu1 %v217_v45 }
  0x9c   : > { %453 = vmatmul.mubr.f32.gmra.mxu0 %v216_v46  ;;  %668 = vmatmul.mubr.f32.gmra.mxu1 %v216_v46 }
  0x9d   : > { %458 = vmatprep.mubr.f32.mxu0 %v219_v47  ;;  %672 = vmatprep.mubr.f32.mxu1 %v219_v47 }
  0xa0   : > { %459 = vmatmul.mubr.f32.gmra.mxu0 %v218_v48  ;;  %673 = vmatmul.mubr.f32.gmra.mxu1 %v218_v48 }
  0xa1   : > { %464 = vmatprep.mubr.f32.mxu0 %v221_v49  ;;  %677 = vmatprep.mubr.f32.mxu1 %v221_v49 }
  0xa4   : > { %465 = vmatmul.mubr.f32.gmra.mxu0 %v220_v50  ;;  %678 = vmatmul.mubr.f32.gmra.mxu1 %v220_v50 }
  0xa5   : > { %470 = vmatprep.mubr.f32.mxu0 %v223_v51  ;;  %682 = vmatprep.mubr.f32.mxu1 %v223_v51 }
  0xa8   : > { %471 = vmatmul.mubr.f32.gmra.mxu0 %v222_v52  ;;  %683 = vmatmul.mubr.f32.gmra.mxu1 %v222_v52 }
  0xa9   : > { %476 = vmatprep.mubr.f32.mxu0 %v225_v53  ;;  %687 = vmatprep.mubr.f32.mxu1 %v225_v53 }
  0xac   : > { %477 = vmatmul.mubr.f32.gmra.mxu0 %v224_v54  ;;  %688 = vmatmul.mubr.f32.gmra.mxu1 %v224_v54 }
  0xad   : > { %482 = vmatprep.mubr.f32.mxu0 %v227_v55  ;;  %692 = vmatprep.mubr.f32.mxu1 %v227_v55 }
  0xb0   : > { %483 = vmatmul.mubr.f32.gmra.mxu0 %v226_v56  ;;  %693 = vmatmul.mubr.f32.gmra.mxu1 %v226_v56 }
  0xb1   : > { %488 = vmatprep.mubr.f32.mxu0 %v229_v57  ;;  %697 = vmatprep.mubr.f32.mxu1 %v229_v57 }
  0xb4   : > { %489 = vmatmul.mubr.f32.gmra.mxu0 %v228_v58  ;;  %698 = vmatmul.mubr.f32.gmra.mxu1 %v228_v58 }
  0xb5   : > { %494 = vmatprep.mubr.f32.mxu0 %v231_v59  ;;  %702 = vmatprep.mubr.f32.mxu1 %v231_v59 }
  0xb8   : > { %495 = vmatmul.mubr.f32.gmra.mxu0 %v230_v60  ;;  %703 = vmatmul.mubr.f32.gmra.mxu1 %v230_v60 }
  0xb9   : > { %500 = vmatprep.mubr.f32.mxu0 %v233_v61  ;;  %707 = vmatprep.mubr.f32.mxu1 %v233_v61 }
  0xbc   : > { %501 = vmatmul.mubr.f32.gmra.mxu0 %v232_v62  ;;  %708 = vmatmul.mubr.f32.gmra.mxu1 %v232_v62 }
  0xbd   : > { %506 = vmatprep.mubr.f32.mxu0 %v235_v63  ;;  %712 = vmatprep.mubr.f32.mxu1 %v235_v63 }
  0xc0   : > { %507 = vmatmul.mubr.f32.gmra.mxu0 %v234_v1  ;;  %713 = vmatmul.mubr.f32.gmra.mxu1 %v234_v1 }
  0xc1   : > { %512 = vmatprep.mubr.f32.mxu0 %v237_v2  ;;  %717 = vmatprep.mubr.f32.mxu1 %v237_v2 }
  0xc4   : > { %513 = vmatmul.mubr.f32.gmra.mxu0 %v236_v3  ;;  %718 = vmatmul.mubr.f32.gmra.mxu1 %v236_v3 }
  0xc5   : > { %518 = vmatprep.mubr.f32.mxu0 %v239_v4  ;;  %722 = vmatprep.mubr.f32.mxu1 %v239_v4 }
  0xc8   : > { %519 = vmatmul.mubr.f32.gmra.mxu0 %v238_v5  ;;  %723 = vmatmul.mubr.f32.gmra.mxu1 %v238_v5 }
  0xc9   : > { %524 = vmatprep.mubr.f32.mxu0 %v241_v6  ;;  %727 = vmatprep.mubr.f32.mxu1 %v241_v6 }
  0xcc   : > { %525 = vmatmul.mubr.f32.gmra.mxu0 %v240_v7  ;;  %728 = vmatmul.mubr.f32.gmra.mxu1 %v240_v7 }
  0xcd   : > { %530 = vmatprep.mubr.f32.mxu0 %v243_v8  ;;  %732 = vmatprep.mubr.f32.mxu1 %v243_v8 }
  0xd0   : > { %531 = vmatmul.mubr.f32.gmra.mxu0 %v242_v9  ;;  %733 = vmatmul.mubr.f32.gmra.mxu1 %v242_v9 }
  0xd1   : > { %536 = vmatprep.mubr.f32.mxu0 %v245_v10  ;;  %737 = vmatprep.mubr.f32.mxu1 %v245_v10 }
  0xd4   : > { %537 = vmatmul.mubr.f32.gmra.mxu0 %v244_v11  ;;  %738 = vmatmul.mubr.f32.gmra.mxu1 %v244_v11 }
  0xd5   : > { %542 = vmatprep.mubr.f32.mxu0 %v247_v12  ;;  %742 = vmatprep.mubr.f32.mxu1 %v247_v12 }
  0xd8   : > { %543 = vmatmul.mubr.f32.gmra.mxu0 %v246_v13  ;;  %743 = vmatmul.mubr.f32.gmra.mxu1 %v246_v13 }
  0xd9   : > { %548 = vmatprep.mubr.f32.mxu0 %v249_v14  ;;  %747 = vmatprep.mubr.f32.mxu1 %v249_v14 }
  0xdc   : > { %549 = vmatmul.mubr.f32.gmra.mxu0 %v248_v15  ;;  %748 = vmatmul.mubr.f32.gmra.mxu1 %v248_v15 }
  0xdd   : > { %554 = vmatprep.mubr.f32.mxu0 %v251_v16  ;;  %752 = vmatprep.mubr.f32.mxu1 %v251_v16 }
  0xe0   : > { %555 = vmatmul.mubr.f32.gmra.mxu0 %v250_v17  ;;  %753 = vmatmul.mubr.f32.gmra.mxu1 %v250_v17 }
  0xe1   : > { %560 = vmatprep.mubr.f32.mxu0 %v253_v18  ;;  %757 = vmatprep.mubr.f32.mxu1 %v253_v18 }
  0xe4   : > { %561 = vmatmul.mubr.f32.gmra.mxu0 %v252_v19  ;;  %758 = vmatmul.mubr.f32.gmra.mxu1 %v252_v19 }
  0xe5   : > { %566 = vmatprep.mubr.f32.mxu0 %v255_v20  ;;  %762 = vmatprep.mubr.f32.mxu1 %v255_v20 }
  0xe8   : > { %567 = vmatmul.mubr.f32.gmra.mxu0 %v254_v21  ;;  %763 = vmatmul.mubr.f32.gmra.mxu1 %v254_v21 }
 0x144   : > { %v418_v22 = vpop.f32.mrf.mxu0  ;;  %v639_v23 = vpop.f32.mrf.mxu1 }
 0x145   : > { %768 = vst [vmem:[%s1486_s18] sm:$0xff] %v418_v22  ;;  %770 = vst [vmem:[%s1486_s18 + $0x10] sm:$0xff] %v639_v23 }
 0x146   : > { %v420_v24 = vpop.f32.mrf.mxu0  ;;  %v641_v25 = vpop.f32.mrf.mxu1 }
 0x147   : > { %769 = vst [vmem:[%s1486_s18 + $0x8] sm:$0xff] %v420_v24 }
 0x148   : > { %v424_v26 = vpop.f32.mrf.mxu0  ;;  %v644_v27 = vpop.f32.mrf.mxu1 }
 0x149   : > { %771 = vst [vmem:[%s1486_s18 + $0x18] sm:$0xff] %v424_v26  ;;  %773 = vst [vmem:[%s1486_s18 + $0x28] sm:$0xff] %v644_v27 }
 0x14a   : > { %v426_v28 = vpop.f32.mrf.mxu0  ;;  %v646_v29 = vpop.f32.mrf.mxu1 }
 0x14b   : > { %772 = vst [vmem:[%s1486_s18 + $0x20] sm:$0xff] %v426_v28 }
 0x14c   : > { %v430_v30 = vpop.f32.mrf.mxu0  ;;  %v649_v31 = vpop.f32.mrf.mxu1 }
 0x14d   : > { %774 = vst [vmem:[%s1486_s18 + $0x30] sm:$0xff] %v430_v30  ;;  %776 = vst [vmem:[%s1486_s18 + $0x40] sm:$0xff] %v649_v31 }
 0x14e   : > { %v432_v32 = vpop.f32.mrf.mxu0  ;;  %v651_v33 = vpop.f32.mrf.mxu1 }
 0x14f   : > { %775 = vst [vmem:[%s1486_s18 + $0x38] sm:$0xff] %v432_v32 }
 0x150   : > { %v436_v34 = vpop.f32.mrf.mxu0  ;;  %v654_v35 = vpop.f32.mrf.mxu1 }
 0x151   : > { %777 = vst [vmem:[%s1486_s18 + $0x48] sm:$0xff] %v436_v34  ;;  %779 = vst [vmem:[%s1486_s18 + $0x58] sm:$0xff] %v654_v35 }
 0x152   : > { %v438_v36 = vpop.f32.mrf.mxu0  ;;  %v656_v37 = vpop.f32.mrf.mxu1 }
 0x153   : > { %778 = vst [vmem:[%s1486_s18 + $0x50] sm:$0xff] %v438_v36 }
 0x154   : > { %v442_v38 = vpop.f32.mrf.mxu0  ;;  %v659_v39 = vpop.f32.mrf.mxu1 }
 0x155   : > { %780 = vst [vmem:[%s1486_s18 + $0x60] sm:$0xff] %v442_v38  ;;  %782 = vst [vmem:[%s1486_s18 + $0x70] sm:$0xff] %v659_v39 }
 0x156   : > { %v444_v40 = vpop.f32.mrf.mxu0  ;;  %v661_v0 = vpop.f32.mrf.mxu1 }
 0x157   : > { %781 = vst [vmem:[%s1486_s18 + $0x68] sm:$0xff] %v444_v40 }
 0x158   : > { %v448_v41 = vpop.f32.mrf.mxu0  ;;  %v664_v42 = vpop.f32.mrf.mxu1 }
 0x159   : > { %783 = vst [vmem:[%s1486_s18 + $0x78] sm:$0xff] %v448_v41  ;;  %785 = vst [vmem:[%s1486_s18 + $0x88] sm:$0xff] %v664_v42 }
 0x15a   : > { %v450_v43 = vpop.f32.mrf.mxu0  ;;  %v666_v44 = vpop.f32.mrf.mxu1 }
 0x15b   : > { %784 = vst [vmem:[%s1486_s18 + $0x80] sm:$0xff] %v450_v43 }
 0x15c   : > { %v454_v45 = vpop.f32.mrf.mxu0  ;;  %v669_v46 = vpop.f32.mrf.mxu1 }
 0x15d   : > { %786 = vst [vmem:[%s1486_s18 + $0x90] sm:$0xff] %v454_v45  ;;  %788 = vst [vmem:[%s1486_s18 + $0xa0] sm:$0xff] %v669_v46 }
 0x15e   : > { %v456_v47 = vpop.f32.mrf.mxu0  ;;  %v671_v48 = vpop.f32.mrf.mxu1 }
 0x15f   : > { %787 = vst [vmem:[%s1486_s18 + $0x98] sm:$0xff] %v456_v47 }
 0x160   : > { %v460_v49 = vpop.f32.mrf.mxu0  ;;  %v674_v50 = vpop.f32.mrf.mxu1 }
 0x161   : > { %789 = vst [vmem:[%s1486_s18 + $0xa8] sm:$0xff] %v460_v49  ;;  %791 = vst [vmem:[%s1486_s18 + $0xb8] sm:$0xff] %v674_v50 }
 0x162   : > { %v462_v51 = vpop.f32.mrf.mxu0  ;;  %v676_v52 = vpop.f32.mrf.mxu1 }
 0x163   : > { %790 = vst [vmem:[%s1486_s18 + $0xb0] sm:$0xff] %v462_v51 }
 0x164   : > { %v466_v53 = vpop.f32.mrf.mxu0  ;;  %v679_v54 = vpop.f32.mrf.mxu1 }
 0x165   : > { %792 = vst [vmem:[%s1486_s18 + $0xc0] sm:$0xff] %v466_v53  ;;  %794 = vst [vmem:[%s1486_s18 + $0xd0] sm:$0xff] %v679_v54 }
 0x166   : > { %v468_v55 = vpop.f32.mrf.mxu0  ;;  %v681_v56 = vpop.f32.mrf.mxu1 }
 0x167   : > { %793 = vst [vmem:[%s1486_s18 + $0xc8] sm:$0xff] %v468_v55 }
 0x168   : > { %v472_v57 = vpop.f32.mrf.mxu0  ;;  %v684_v58 = vpop.f32.mrf.mxu1 }
 0x169   : > { %795 = vst [vmem:[%s1486_s18 + $0xd8] sm:$0xff] %v472_v57  ;;  %797 = vst [vmem:[%s1486_s18 + $0xe8] sm:$0xff] %v684_v58 }
 0x16a   : > { %v474_v59 = vpop.f32.mrf.mxu0  ;;  %v686_v60 = vpop.f32.mrf.mxu1 }
 0x16b   : > { %796 = vst [vmem:[%s1486_s18 + $0xe0] sm:$0xff] %v474_v59 }
 0x16c   : > { %v478_v61 = vpop.f32.mrf.mxu0  ;;  %v689_v62 = vpop.f32.mrf.mxu1 }
 0x16d   : > { %798 = vst [vmem:[%s1486_s18 + $0xf0] sm:$0xff] %v478_v61  ;;  %800 = vst [vmem:[%s1486_s18 + $0x100] sm:$0xff] %v689_v62 }
 0x16e   : > { %v480_v63 = vpop.f32.mrf.mxu0  ;;  %v691_v1 = vpop.f32.mrf.mxu1 }
 0x16f   : > { %799 = vst [vmem:[%s1486_s18 + $0xf8] sm:$0xff] %v480_v63 }
 0x170   : > { %v484_v2 = vpop.f32.mrf.mxu0  ;;  %v694_v3 = vpop.f32.mrf.mxu1 }
 0x171   : > { %801 = vst [vmem:[%s1486_s18 + $0x108] sm:$0xff] %v484_v2  ;;  %803 = vst [vmem:[%s1486_s18 + $0x118] sm:$0xff] %v694_v3 }
 0x172   : > { %v486_v4 = vpop.f32.mrf.mxu0  ;;  %v696_v5 = vpop.f32.mrf.mxu1 }
 0x173   : > { %802 = vst [vmem:[%s1486_s18 + $0x110] sm:$0xff] %v486_v4 }
 0x174   : > { %v490_v6 = vpop.f32.mrf.mxu0  ;;  %v699_v7 = vpop.f32.mrf.mxu1 }
 0x175   : > { %804 = vst [vmem:[%s1486_s18 + $0x120] sm:$0xff] %v490_v6  ;;  %806 = vst [vmem:[%s1486_s18 + $0x130] sm:$0xff] %v699_v7 }
 0x176   : > { %v492_v8 = vpop.f32.mrf.mxu0  ;;  %v701_v9 = vpop.f32.mrf.mxu1 }
 0x177   : > { %805 = vst [vmem:[%s1486_s18 + $0x128] sm:$0xff] %v492_v8 }
 0x178   : > { %v496_v10 = vpop.f32.mrf.mxu0  ;;  %v704_v11 = vpop.f32.mrf.mxu1 }
 0x179   : > { %807 = vst [vmem:[%s1486_s18 + $0x138] sm:$0xff] %v496_v10  ;;  %809 = vst [vmem:[%s1486_s18 + $0x148] sm:$0xff] %v704_v11 }
 0x17a   : > { %v498_v12 = vpop.f32.mrf.mxu0  ;;  %v706_v13 = vpop.f32.mrf.mxu1 }
 0x17b   : > { %808 = vst [vmem:[%s1486_s18 + $0x140] sm:$0xff] %v498_v12 }
 0x17c   : > { %v502_v14 = vpop.f32.mrf.mxu0  ;;  %v709_v15 = vpop.f32.mrf.mxu1 }
 0x17d   : > { %810 = vst [vmem:[%s1486_s18 + $0x150] sm:$0xff] %v502_v14  ;;  %812 = vst [vmem:[%s1486_s18 + $0x160] sm:$0xff] %v709_v15 }
 0x17e   : > { %v504_v16 = vpop.f32.mrf.mxu0  ;;  %v711_v17 = vpop.f32.mrf.mxu1 }
 0x17f   : > { %811 = vst [vmem:[%s1486_s18 + $0x158] sm:$0xff] %v504_v16 }
 0x180   : > { %v508_v18 = vpop.f32.mrf.mxu0  ;;  %v714_v19 = vpop.f32.mrf.mxu1 }
 0x181   : > { %813 = vst [vmem:[%s1486_s18 + $0x168] sm:$0xff] %v508_v18  ;;  %815 = vst [vmem:[%s1486_s18 + $0x178] sm:$0xff] %v714_v19 }
 0x182   : > { %v510_v20 = vpop.f32.mrf.mxu0  ;;  %v716_v21 = vpop.f32.mrf.mxu1 }
 0x183   : > { %814 = vst [vmem:[%s1486_s18 + $0x170] sm:$0xff] %v510_v20 }
 0x184   : > { %v514_v22 = vpop.f32.mrf.mxu0  ;;  %v719_v23 = vpop.f32.mrf.mxu1 }
 0x185   : > { %816 = vst [vmem:[%s1486_s18 + $0x180] sm:$0xff] %v514_v22  ;;  %818 = vst [vmem:[%s1486_s18 + $0x190] sm:$0xff] %v719_v23 }
 0x186   : > { %v516_v24 = vpop.f32.mrf.mxu0  ;;  %v721_v25 = vpop.f32.mrf.mxu1 }
 0x187   : > { %817 = vst [vmem:[%s1486_s18 + $0x188] sm:$0xff] %v516_v24 }
 0x188   : > { %v520_v26 = vpop.f32.mrf.mxu0  ;;  %v724_v27 = vpop.f32.mrf.mxu1 }
 0x189   : > { %819 = vst [vmem:[%s1486_s18 + $0x198] sm:$0xff] %v520_v26  ;;  %821 = vst [vmem:[%s1486_s18 + $0x1a8] sm:$0xff] %v724_v27 }
 0x18a   : > { %v522_v28 = vpop.f32.mrf.mxu0  ;;  %v726_v29 = vpop.f32.mrf.mxu1 }
 0x18b   : > { %820 = vst [vmem:[%s1486_s18 + $0x1a0] sm:$0xff] %v522_v28 }
 0x18c   : > { %v526_v30 = vpop.f32.mrf.mxu0  ;;  %v729_v31 = vpop.f32.mrf.mxu1 }
 0x18d   : > { %822 = vst [vmem:[%s1486_s18 + $0x1b0] sm:$0xff] %v526_v30  ;;  %824 = vst [vmem:[%s1486_s18 + $0x1c0] sm:$0xff] %v729_v31 }
 0x18e   : > { %v528_v32 = vpop.f32.mrf.mxu0  ;;  %v731_v33 = vpop.f32.mrf.mxu1 }
 0x18f   : > { %823 = vst [vmem:[%s1486_s18 + $0x1b8] sm:$0xff] %v528_v32 }
 0x190   : > { %v532_v34 = vpop.f32.mrf.mxu0  ;;  %v734_v35 = vpop.f32.mrf.mxu1 }
 0x191   : > { %825 = vst [vmem:[%s1486_s18 + $0x1c8] sm:$0xff] %v532_v34  ;;  %827 = vst [vmem:[%s1486_s18 + $0x1d8] sm:$0xff] %v734_v35 }
 0x192   : > { %v534_v36 = vpop.f32.mrf.mxu0  ;;  %v736_v37 = vpop.f32.mrf.mxu1 }
 0x193   : > { %826 = vst [vmem:[%s1486_s18 + $0x1d0] sm:$0xff] %v534_v36 }
 0x194   : > { %v538_v38 = vpop.f32.mrf.mxu0  ;;  %v739_v39 = vpop.f32.mrf.mxu1 }
 0x195   : > { %828 = vst [vmem:[%s1486_s18 + $0x1e0] sm:$0xff] %v538_v38  ;;  %830 = vst [vmem:[%s1486_s18 + $0x1f0] sm:$0xff] %v739_v39 }
 0x196   : > { %v540_v40 = vpop.f32.mrf.mxu0  ;;  %v741_v0 = vpop.f32.mrf.mxu1 }
 0x197   : > { %829 = vst [vmem:[%s1486_s18 + $0x1e8] sm:$0xff] %v540_v40 }
 0x198   : > { %v544_v41 = vpop.f32.mrf.mxu0  ;;  %v744_v42 = vpop.f32.mrf.mxu1 }
 0x199   : > { %831 = vst [vmem:[%s1486_s18 + $0x1f8] sm:$0xff] %v544_v41  ;;  %833 = vst [vmem:[%s1486_s18 + $0x208] sm:$0xff] %v744_v42 }
 0x19a   : > { %v546_v43 = vpop.f32.mrf.mxu0  ;;  %v746_v44 = vpop.f32.mrf.mxu1 }
 0x19b   : > { %832 = vst [vmem:[%s1486_s18 + $0x200] sm:$0xff] %v546_v43 }
 0x19c   : > { %v550_v45 = vpop.f32.mrf.mxu0  ;;  %v749_v46 = vpop.f32.mrf.mxu1 }
 0x19d   : > { %834 = vst [vmem:[%s1486_s18 + $0x210] sm:$0xff] %v550_v45  ;;  %836 = vst [vmem:[%s1486_s18 + $0x220] sm:$0xff] %v749_v46 }
 0x19e   : > { %v552_v47 = vpop.f32.mrf.mxu0  ;;  %v751_v48 = vpop.f32.mrf.mxu1 }
 0x19f   : > { %835 = vst [vmem:[%s1486_s18 + $0x218] sm:$0xff] %v552_v47 }
 0x1a0   : > { %v556_v49 = vpop.f32.mrf.mxu0  ;;  %v754_v50 = vpop.f32.mrf.mxu1 }
 0x1a1   : > { %837 = vst [vmem:[%s1486_s18 + $0x228] sm:$0xff] %v556_v49  ;;  %839 = vst [vmem:[%s1486_s18 + $0x238] sm:$0xff] %v754_v50 }
 0x1a2   : > { %v558_v51 = vpop.f32.mrf.mxu0  ;;  %v756_v52 = vpop.f32.mrf.mxu1 }
 0x1a3   : > { %838 = vst [vmem:[%s1486_s18 + $0x230] sm:$0xff] %v558_v51 }
 0x1a4   : > { %v562_v53 = vpop.f32.mrf.mxu0  ;;  %v759_v54 = vpop.f32.mrf.mxu1 }
 0x1a5   : > { %840 = vst [vmem:[%s1486_s18 + $0x240] sm:$0xff] %v562_v53  ;;  %842 = vst [vmem:[%s1486_s18 + $0x250] sm:$0xff] %v759_v54 }
 0x1a6   : > { %v564_v55 = vpop.f32.mrf.mxu0  ;;  %v761_v56 = vpop.f32.mrf.mxu1 }
 0x1a7   : > { %841 = vst [vmem:[%s1486_s18 + $0x248] sm:$0xff] %v564_v55 }
 0x1a8   : > { %v568_v57 = vpop.f32.mrf.mxu0  ;;  %v764_v58 = vpop.f32.mrf.mxu1 }
 0x1a9   : > { %843 = vst [vmem:[%s1486_s18 + $0x258] sm:$0xff] %v568_v57  ;;  %845 = vst [vmem:[%s1486_s18 + $0x268] sm:$0xff] %v764_v58 }
 0x1aa   : > { %v570_v59 = vpop.f32.mrf.mxu0  ;;  %v766_v60 = vpop.f32.mrf.mxu1 }
 0x1ab   : > { %844 = vst [vmem:[%s1486_s18 + $0x260] sm:$0xff] %v570_v59 }
 0x1ac   : > { %1126 = shalt.err (!%p1123_p9)
}
 0x1ad   : > { %s1127_s4 = scalar_lea.hbm %s1568_s30, 9984  ;;  %s1131_s6 = scalar_lea.hbm %s1623_s2, 19968 }
 0x1ae   : > { %p1128_p0 = scmp.ne.s32.totalorder %s1568_s30, %s1127_s4  ;;  %p1132_p6 = scmp.lt.s32.totalorder %s1568_s30, %s1623_s2 }
 0x1af   : > { %p1133_p10 = scmp.lt.s32.totalorder %s1131_s6, %s1127_s4 }
 0x1b0   : > { %p1129_p1 = pnand %p1128_p0, %p1645_p11 }
 0x1b1   : > { %p1134_p2 = por %p1133_p10, %p1132_p6 }
 0x1b2   : > { %p1130_p4 = pneg %p1129_p1 }
 0x1b4   : > { %p1135_p12 = pnand %p1134_p2, %p1130_p4 }
 0x1b6   : > { %1138 = shalt.err (!%p1135_p12)
}
 0x1b7   : > { %s1208_s16 = smov 384   ;;  %s1209_s19 = smov 768  }
 0x1b8   : > { %s1210_s14 = smov 24  }
 0x1b9   : > { %983 = dma.vmem_to_hbm [thread:$0]  (%p1645_p11), %s1570_s23, 9984, %s1568_s30, %s847_s12, %s1208_s16, %s1209_s19, %s1210_s14  }
 0x1ba PF: > { %s1646_s18 = sld [smem:[#allocation12_spill]]  ;;  %s878_s27 = sand.u32 1, %s1177_s9  }
 0x1bb   : > { %s1647_s20 = sld [smem:[#allocation11_spill]]  ;;  %s879_s24 = scalar_lea.sflag [#allocation4], %s878_s27 }
 0x1c0   : > { %p1648_p13 = scmp.ne.s32.totalorder %s1646_s18, 0 }
 0x1c1   : > { %p1649_p3 = scmp.ge.s32.totalorder %s1647_s20, 2 }
 0x1c3   : > { %p994_p5 = pnand %p1649_p3, %p1648_p13 }
 0x1c5   : > { %p995_p7 = pneg %p994_p5 }
 0x1c7   : > { %1172 = dma.done.wait (%p995_p7), %s879_s24, 9984  }
 0x1c8   : > { %1174 = vsyncadd (%p995_p7), %s879_s24, 4294957312  ;;  %s19_s14 = sadd.s32 1, %s1647_s20   ;;  %s1650_s9 = smov %s1181_s10 }
 0x1c9   : > { %p16_p8 = scmp.ge.s32.totalorder %s19_s14, 4   ;;  %s1651_s10 = smov %s1185_s11 }
 0x1ca   : > { %s1652_s11 = smov %s1334_s22  ;;  %s1653_s12 = smov %s1193_s13 }
 0x1cb   : > { %s1654_s13 = smov %s1656_s28  ;;  %18 = sbr.rel (!%p16_p8) target bundleno = 7 (0x7), region = 79 }
 0x1d0   :  { %884 = vsyncpa [#allocation3], 1 }
 0x1d1   :  { %886 = vsyncpa [#allocation3 + $0x1], 1 }
 0x1d2   :  { %887 = vsyncpa [#allocation6], 1 }
 0x1d3   :  { %889 = vsyncpa [#allocation6 + $0x1], 1 }
 0x1d4   :  { %890 = vsyncpa [#allocation4], 1 }
 0x1d5   :  { %892 = vsyncpa [#allocation4 + $0x1], 1 }

</bundles_post_ra>
